<compile_context>
chip_gen: v5e
topology: v5e:2x2
jax: 0.10.0
libtpu: 0.0.40
codegen_flags: <defaults>
</compile_context>

<pallas_src>
import functools

import jax
import jax.numpy as jnp
from jax.experimental import pallas as pl
from jax.experimental.pallas import tpu as pltpu


NEG_SLOPE = 0.01  # torch.nn.LeakyReLU default negative_slope


def _algonet_kernel(
    xl_ref,       # [N, F+L]    bf16  cat(node_features, last_latent)
    ef_ref,       # [M, Fe]     bf16  edge features
    src_ref,      # [M, 1]      int32 src node index per edge (column layout)
    dst_ref,      # [M, 1]      int32 dst node index per edge (column layout)
    dst_row_ref,  # [1, M]      int32 dst indices, row layout (scatter transpose)
    w_enc_ref,    # [F+L, L]    bf16  node encoder
    w_edge_ref,   # [Fe, L]     bf16  edge encoder
    w_msge_ref,   # [L, L]      bf16  message: edge part
    w_np_ref,     # [L, 4*SEG]  bf16  packed, lane-padded [msg_s|msg_d|upd_h|dec_h]
    w_ua_ref,     # [L, L]      bf16  update: aggregation part
    w_dl_ref,     # [L, F]      bf16  decoder: latent part
    w_t_ref,      # [1, L]      f32   termination head (row layout)
    out_ref,      # [N, P]      f32   [latent | decoder_out | term | zero pad]
    *,
    latent_features,
    node_out_features,
    seg,
):
    L = latent_features
    F = node_out_features
    N = xl_ref.shape[0]
    M = ef_ref.shape[0]
    P = out_ref.shape[1]

    def leaky(v):            # f32 elementwise (v5e-safe VPU path)
        return jnp.where(v > 0, v, NEG_SLOPE * v)

    def bf(v):               # cast MXU operands only
        return v.astype(jnp.bfloat16)

    def dot(a, b):           # bf16 x bf16 -> f32 accumulate on the MXU
        return jnp.dot(a, b, preferred_element_type=jnp.float32)

    # ---- encoders ----------------------------------------------------------
    node_enc = leaky(dot(xl_ref[...], w_enc_ref[...]))          # [N, L]  f32
    edge_enc = leaky(dot(ef_ref[...], w_edge_ref[...]))         # [M, L]  f32

    # ---- one wide packed matmul for everything consuming node_enc ----------
    # Segments are lane-padded to `seg` (multiple of 128) so each slice start
    # is (8,128)-tile aligned.
    node_proj = dot(bf(node_enc), w_np_ref[...])                 # [N, 4*seg] f32
    s_proj = node_proj[:, 0:L]                                   # src message part
    d_proj = node_proj[:, seg:seg + L]                           # dst message part
    upd_h = node_proj[:, 2 * seg:2 * seg + L]                    # node update part
    dec_h = node_proj[:, 3 * seg:3 * seg + F]                    # decoder node part

    # ---- one-hot gather/scatter built in-kernel (bool -> bf16, no f32) -----
    col2 = jax.lax.broadcasted_iota(jnp.int32, (M, 2 * N), 1)
    g_sd = ((col2 == src_ref[...]) |
            (col2 == dst_ref[...] + N)).astype(jnp.bfloat16)     # [M, 2N]
    row_iota = jax.lax.broadcasted_iota(jnp.int32, (N, M), 0)
    g_dst_t = (row_iota == dst_row_ref[...]).astype(jnp.bfloat16)  # [N, M]

    # ---- processor: one linear-MPNN step ------------------------------------
    # Fused src+dst gather: one [M,2N]@[2N,L] push instead of two [M,N]@[N,L].
    sd_stack = bf(jnp.concatenate([s_proj, d_proj], axis=0))     # [2N, L]
    msg = jnp.maximum(
        dot(g_sd, sd_stack) + dot(bf(edge_enc), w_msge_ref[...]), 0.0)  # [M, L]
    agg = dot(g_dst_t, bf(msg))                                  # [N, L] sum over in-edges
    latent = jnp.maximum(upd_h + dot(bf(agg), w_ua_ref[...]), 0.0)      # [N, L]

    # ---- decoder: Linear(cat(node_enc, latent)) -----------------------------
    dec = dec_h + dot(bf(latent), w_dl_ref[...])                 # [N, F]

    # ---- termination: sigmoid(Linear(latent.mean(0))) on the VPU ------------
    mean_lat = jnp.mean(latent, axis=0, keepdims=True)           # [1, L]
    term = jax.nn.sigmoid(
        jnp.sum(mean_lat * w_t_ref[...], axis=1, keepdims=True))  # [1, 1]

    # ---- single lane-dense output slab, one unmasked full-width store -------
    pieces = [latent, dec, jnp.broadcast_to(term, (N, 1))]
    pad = P - (L + F + 1)
    if pad > 0:
        pieces.append(jnp.zeros((N, pad), jnp.float32))
    out_ref[...] = jnp.concatenate(pieces, axis=1)


def init_params(key, node_features, edge_features, latent_features):
    """Deterministic, bias-free parameter init ([in, out] layout)."""
    F, Fe, L = node_features, edge_features, latent_features
    keys = jax.random.split(key, 11)

    def w(k, din, dout):
        scale = 1.0 / jnp.sqrt(jnp.float32(din))
        return jax.random.uniform(k, (din, dout), jnp.float32, -scale, scale)

    return {
        "w_node_x": w(keys[0], F, L),    # node_encoder weight, x part
        "w_node_l": w(keys[1], L, L),    # node_encoder weight, last_latent part
        "w_edge":   w(keys[2], Fe, L),   # edge_encoder weight
        "w_msg_s":  w(keys[3], L, L),    # processor message, src part
        "w_msg_d":  w(keys[4], L, L),    # processor message, dst part
        "w_msg_e":  w(keys[5], L, L),    # processor message, edge part
        "w_upd_h":  w(keys[6], L, L),    # processor update, node_enc part
        "w_upd_a":  w(keys[7], L, L),    # processor update, aggregation part
        "w_dec_h":  w(keys[8], L, F),    # decoder weight, node_enc part
        "w_dec_l":  w(keys[9], L, F),    # decoder weight, latent part
        "w_term":   w(keys[10], L, 1),   # termination head
    }


def algorithm_network_forward(params, node_features, edge_features, edge_index, last_latent):
    """Mirrors AlgorithmNetworkBase.forward -> (output, latent_features, term)."""
    N, F = node_features.shape
    M, Fe = edge_features.shape
    L = last_latent.shape[1]
    P = ((L + F + 1 + 127) // 128) * 128          # lane-dense output slab width
    SEG = ((max(L, F) + 127) // 128) * 128        # per-segment lane padding for w_np

    # ---- wrapper-side packing (tiny tensors, done once per call) ------------
    xl = jnp.concatenate([node_features, last_latent], axis=1).astype(jnp.bfloat16)
    ef = edge_features.astype(jnp.bfloat16)
    src_cm = edge_index[0].reshape(M, 1).astype(jnp.int32)       # [M, 1]
    dst_cm = edge_index[1].reshape(M, 1).astype(jnp.int32)       # [M, 1]
    dst_rm = edge_index[1:2].astype(jnp.int32)                   # [1, M]

    def lane_pad(w, width):
        return jnp.pad(w, ((0, 0), (0, width - w.shape[1])))

    w_enc = jnp.concatenate(
        [params["w_node_x"], params["w_node_l"]], axis=0).astype(jnp.bfloat16)
    w_edge = params["w_edge"].astype(jnp.bfloat16)
    w_msge = params["w_msg_e"].astype(jnp.bfloat16)
    w_np = jnp.concatenate(
        [lane_pad(params["w_msg_s"], SEG), lane_pad(params["w_msg_d"], SEG),
         lane_pad(params["w_upd_h"], SEG), lane_pad(params["w_dec_h"], SEG)],
        axis=1).astype(jnp.bfloat16)                              # [L, 4*SEG]
    w_ua = params["w_upd_a"].astype(jnp.bfloat16)
    w_dl = params["w_dec_l"].astype(jnp.bfloat16)
    w_t = params["w_term"].T.astype(jnp.float32)                  # [1, L]

    inputs = (xl, ef, src_cm, dst_cm, dst_rm,
              w_enc, w_edge, w_msge, w_np, w_ua, w_dl, w_t)

    flops = 2 * (
        N * (F + L) * L          # node encoder
        + M * Fe * L             # edge encoder
        + N * L * (4 * SEG)      # packed node projection
        + M * (2 * N) * L        # fused src+dst gather
        + M * L * L              # edge part of message
        + M * N * L              # scatter-add aggregation
        + N * L * L              # aggregation update
        + N * L * F              # decoder latent part
    )
    bytes_accessed = int(
        sum(int(a.size) * a.dtype.itemsize for a in inputs) + N * P * 4)

    # Generation-aware VMEM limit: never above ~3/4 of physical VMEM (keeps
    # double-buffer headroom on v7x's 64 MiB), never below 32 MiB scoped
    # budget nor below 4x the actual live buffer footprint.
    try:
        vmem_cap = int(pltpu.get_tpu_info().vmem_capacity_bytes)
    except Exception:
        vmem_cap = 64 * 1024 * 1024   # conservative (v7x-sized) fallback
    vmem_limit = int(min(vmem_cap * 3 // 4,
                         max(32 * 1024 * 1024, 4 * bytes_accessed)))

    vmem = pl.BlockSpec(memory_space=pltpu.MemorySpace.VMEM)
    slab = pl.pallas_call(
        functools.partial(_algonet_kernel, latent_features=L,
                          node_out_features=F, seg=SEG),
        out_shape=jax.ShapeDtypeStruct((N, P), jnp.float32),
        in_specs=[vmem] * len(inputs),
        out_specs=vmem,
        compiler_params=pltpu.CompilerParams(vmem_limit_bytes=vmem_limit),
        cost_estimate=pl.CostEstimate(
            flops=flops, transcendentals=1, bytes_accessed=bytes_accessed),
    )(*inputs)

    latent = slab[:, 0:L]
    output = slab[:, L:L + F]
    term = slab[0, L + F:L + F + 1]    # shape (1,), matching Linear(L, 1) on a vector
    return output, latent, term


if __name__ == "__main__":
    # Small synthetic problem consistent with the forward signature.
    N_NODES = 8
    N_EDGES = 16
    NODE_F = 4
    EDGE_F = 4
    LATENT = 32

    key = jax.random.PRNGKey(0)
    k_par, k_x, k_e, k_l = jax.random.split(key, 4)

    params = init_params(k_par, NODE_F, EDGE_F, LATENT)

    node_features = jax.random.normal(k_x, (N_NODES, NODE_F), jnp.float32)
    edge_features = jax.random.normal(k_e, (N_EDGES, EDGE_F), jnp.float32)
    last_latent = jax.random.normal(k_l, (N_NODES, LATENT), jnp.float32)
    # deterministic edge_index [2, M] (src row, dst row), PyG convention
    e_ids = jnp.arange(N_EDGES, dtype=jnp.int32)
    edge_index = jnp.stack([e_ids % N_NODES, (e_ids + 1) % N_NODES], axis=0)

    output, latent, term = algorithm_network_forward(
        params, node_features, edge_features, edge_index, last_latent
    )
    jax.block_until_ready((output, latent, term))

    assert output.shape == (N_NODES, NODE_F)
    assert latent.shape == (N_NODES, LATENT)
    assert term.shape == (1,)
    print("KERNEL_OK")
</pallas_src>

<mosaic_0001>
module attributes {stable_mosaic.version = 11 : i64} {
  func.func @_algonet_kernel(%arg0: memref<8x36xbf16, #tpu.memory_space<vmem>>, %arg1: memref<16x4xbf16, #tpu.memory_space<vmem>>, %arg2: memref<16x1xi32, #tpu.memory_space<vmem>>, %arg3: memref<16x1xi32, #tpu.memory_space<vmem>>, %arg4: memref<1x16xi32, #tpu.memory_space<vmem>>, %arg5: memref<36x32xbf16, #tpu.memory_space<vmem>>, %arg6: memref<4x32xbf16, #tpu.memory_space<vmem>>, %arg7: memref<32x32xbf16, #tpu.memory_space<vmem>>, %arg8: memref<32x512xbf16, #tpu.memory_space<vmem>>, %arg9: memref<32x32xbf16, #tpu.memory_space<vmem>>, %arg10: memref<32x4xbf16, #tpu.memory_space<vmem>>, %arg11: memref<1x32xf32, #tpu.memory_space<vmem>>, %arg12: memref<8x128xf32, #tpu.memory_space<vmem>>) attributes {dimension_semantics = [], scalar_prefetch = 0 : i64, scratch_operands = 0 : i64, tpu.core_type = #tpu.core_type<tc>} {
    %c0 = arith.constant 0 : index
    %c0_0 = arith.constant 0 : index
    %0 = vector.load %arg0[%c0, %c0_0] : memref<8x36xbf16, #tpu.memory_space<vmem>>, vector<8x36xbf16>
    %c0_1 = arith.constant 0 : index
    %c0_2 = arith.constant 0 : index
    %1 = vector.load %arg5[%c0_1, %c0_2] : memref<36x32xbf16, #tpu.memory_space<vmem>>, vector<36x32xbf16>
    %cst = arith.constant dense<0.000000e+00> : vector<8x32xf32>
    %2 = tpu.matmul %0, %1, %cst {dimension_numbers = #tpu.dot_dimension_numbers<[1], [0], [0], [1], [0, 0, 1, 1], [], []>} : vector<8x36xbf16>, vector<36x32xbf16>, vector<8x32xf32> -> vector<8x32xf32>
    %cst_3 = arith.constant 0.000000e+00 : f32
    %3 = vector.broadcast %cst_3 : f32 to vector<8x32xf32>
    %4 = arith.cmpf ogt, %2, %3 : vector<8x32xf32>
    %cst_4 = arith.constant 0.00999999977 : f32
    %5 = vector.broadcast %cst_4 : f32 to vector<8x32xf32>
    %6 = arith.mulf %5, %2 : vector<8x32xf32>
    %7 = arith.select %4, %2, %6 : vector<8x32xi1>, vector<8x32xf32>
    %c0_5 = arith.constant 0 : index
    %c0_6 = arith.constant 0 : index
    %8 = vector.load %arg1[%c0_5, %c0_6] : memref<16x4xbf16, #tpu.memory_space<vmem>>, vector<16x4xbf16>
    %c0_7 = arith.constant 0 : index
    %c0_8 = arith.constant 0 : index
    %9 = vector.load %arg6[%c0_7, %c0_8] : memref<4x32xbf16, #tpu.memory_space<vmem>>, vector<4x32xbf16>
    %cst_9 = arith.constant dense<0.000000e+00> : vector<16x32xf32>
    %10 = tpu.matmul %8, %9, %cst_9 {dimension_numbers = #tpu.dot_dimension_numbers<[1], [0], [0], [1], [0, 0, 1, 1], [], []>} : vector<16x4xbf16>, vector<4x32xbf16>, vector<16x32xf32> -> vector<16x32xf32>
    %cst_10 = arith.constant 0.000000e+00 : f32
    %11 = vector.broadcast %cst_10 : f32 to vector<16x32xf32>
    %12 = arith.cmpf ogt, %10, %11 : vector<16x32xf32>
    %cst_11 = arith.constant 0.00999999977 : f32
    %13 = vector.broadcast %cst_11 : f32 to vector<16x32xf32>
    %14 = arith.mulf %13, %10 : vector<16x32xf32>
    %15 = arith.select %12, %10, %14 : vector<16x32xi1>, vector<16x32xf32>
    %16 = arith.truncf %7 : vector<8x32xf32> to vector<8x32xbf16>
    %c0_12 = arith.constant 0 : index
    %c0_13 = arith.constant 0 : index
    %17 = vector.load %arg8[%c0_12, %c0_13] : memref<32x512xbf16, #tpu.memory_space<vmem>>, vector<32x512xbf16>
    %cst_14 = arith.constant dense<0.000000e+00> : vector<8x512xf32>
    %18 = tpu.matmul %16, %17, %cst_14 {dimension_numbers = #tpu.dot_dimension_numbers<[1], [0], [0], [1], [0, 0, 1, 1], [], []>} : vector<8x32xbf16>, vector<32x512xbf16>, vector<8x512xf32> -> vector<8x512xf32>
    %19 = vector.extract_strided_slice %18 {offsets = [0, 0], sizes = [8, 32], strides = [1, 1]} : vector<8x512xf32> to vector<8x32xf32>
    %20 = vector.extract_strided_slice %18 {offsets = [0, 128], sizes = [8, 32], strides = [1, 1]} : vector<8x512xf32> to vector<8x32xf32>
    %21 = vector.extract_strided_slice %18 {offsets = [0, 256], sizes = [8, 32], strides = [1, 1]} : vector<8x512xf32> to vector<8x32xf32>
    %22 = vector.extract_strided_slice %18 {offsets = [0, 384], sizes = [8, 4], strides = [1, 1]} : vector<8x512xf32> to vector<8x4xf32>
    %23 = tpu.iota {dimensions = array<i32: 1>} : vector<16x16xi32>
    %c0_15 = arith.constant 0 : index
    %c0_16 = arith.constant 0 : index
    %24 = vector.load %arg2[%c0_15, %c0_16] : memref<16x1xi32, #tpu.memory_space<vmem>>, vector<16x1xi32>
    %25 = vector.broadcast %24 : vector<16x1xi32> to vector<16x16xi32>
    %26 = arith.cmpi eq, %23, %25 : vector<16x16xi32>
    %c0_17 = arith.constant 0 : index
    %c0_18 = arith.constant 0 : index
    %27 = vector.load %arg3[%c0_17, %c0_18] : memref<16x1xi32, #tpu.memory_space<vmem>>, vector<16x1xi32>
    %c8_i32 = arith.constant 8 : i32
    %28 = vector.broadcast %c8_i32 : i32 to vector<16x1xi32>
    %29 = arith.addi %27, %28 : vector<16x1xi32>
    %30 = vector.broadcast %29 : vector<16x1xi32> to vector<16x16xi32>
    %31 = arith.cmpi eq, %23, %30 : vector<16x16xi32>
    %32 = arith.ori %26, %31 : vector<16x16xi1>
    %33 = arith.extui %32 : vector<16x16xi1> to vector<16x16xi32>
    %34 = arith.sitofp %33 : vector<16x16xi32> to vector<16x16xf32>
    %35 = arith.truncf %34 : vector<16x16xf32> to vector<16x16xbf16>
    %36 = tpu.iota {dimensions = array<i32: 0>} : vector<8x16xi32>
    %c0_19 = arith.constant 0 : index
    %c0_20 = arith.constant 0 : index
    %37 = vector.load %arg4[%c0_19, %c0_20] : memref<1x16xi32, #tpu.memory_space<vmem>>, vector<1x16xi32>
    %38 = vector.broadcast %37 : vector<1x16xi32> to vector<8x16xi32>
    %39 = arith.cmpi eq, %36, %38 : vector<8x16xi32>
    %40 = arith.extui %39 : vector<8x16xi1> to vector<8x16xi32>
    %41 = arith.sitofp %40 : vector<8x16xi32> to vector<8x16xf32>
    %42 = arith.truncf %41 : vector<8x16xf32> to vector<8x16xbf16>
    %43 = tpu.concatenate %19, %20 in 0 : vector<8x32xf32>, vector<8x32xf32> -> vector<16x32xf32>
    %44 = arith.truncf %43 : vector<16x32xf32> to vector<16x32xbf16>
    %cst_21 = arith.constant dense<0.000000e+00> : vector<16x32xf32>
    %45 = tpu.matmul %35, %44, %cst_21 {dimension_numbers = #tpu.dot_dimension_numbers<[1], [0], [0], [1], [0, 0, 1, 1], [], []>} : vector<16x16xbf16>, vector<16x32xbf16>, vector<16x32xf32> -> vector<16x32xf32>
    %46 = arith.truncf %15 : vector<16x32xf32> to vector<16x32xbf16>
    %c0_22 = arith.constant 0 : index
    %c0_23 = arith.constant 0 : index
    %47 = vector.load %arg7[%c0_22, %c0_23] : memref<32x32xbf16, #tpu.memory_space<vmem>>, vector<32x32xbf16>
    %cst_24 = arith.constant dense<0.000000e+00> : vector<16x32xf32>
    %48 = tpu.matmul %46, %47, %cst_24 {dimension_numbers = #tpu.dot_dimension_numbers<[1], [0], [0], [1], [0, 0, 1, 1], [], []>} : vector<16x32xbf16>, vector<32x32xbf16>, vector<16x32xf32> -> vector<16x32xf32>
    %49 = arith.addf %45, %48 : vector<16x32xf32>
    %cst_25 = arith.constant 0.000000e+00 : f32
    %50 = vector.broadcast %cst_25 : f32 to vector<16x32xf32>
    %51 = arith.maximumf %49, %50 : vector<16x32xf32>
    %52 = arith.truncf %51 : vector<16x32xf32> to vector<16x32xbf16>
    %cst_26 = arith.constant dense<0.000000e+00> : vector<8x32xf32>
    %53 = tpu.matmul %42, %52, %cst_26 {dimension_numbers = #tpu.dot_dimension_numbers<[1], [0], [0], [1], [0, 0, 1, 1], [], []>} : vector<8x16xbf16>, vector<16x32xbf16>, vector<8x32xf32> -> vector<8x32xf32>
    %54 = arith.truncf %53 : vector<8x32xf32> to vector<8x32xbf16>
    %c0_27 = arith.constant 0 : index
    %c0_28 = arith.constant 0 : index
    %55 = vector.load %arg9[%c0_27, %c0_28] : memref<32x32xbf16, #tpu.memory_space<vmem>>, vector<32x32xbf16>
    %cst_29 = arith.constant dense<0.000000e+00> : vector<8x32xf32>
    %56 = tpu.matmul %54, %55, %cst_29 {dimension_numbers = #tpu.dot_dimension_numbers<[1], [0], [0], [1], [0, 0, 1, 1], [], []>} : vector<8x32xbf16>, vector<32x32xbf16>, vector<8x32xf32> -> vector<8x32xf32>
    %57 = arith.addf %21, %56 : vector<8x32xf32>
    %cst_30 = arith.constant 0.000000e+00 : f32
    %58 = vector.broadcast %cst_30 : f32 to vector<8x32xf32>
    %59 = arith.maximumf %57, %58 : vector<8x32xf32>
    %60 = arith.truncf %59 : vector<8x32xf32> to vector<8x32xbf16>
    %c0_31 = arith.constant 0 : index
    %c0_32 = arith.constant 0 : index
    %61 = vector.load %arg10[%c0_31, %c0_32] : memref<32x4xbf16, #tpu.memory_space<vmem>>, vector<32x4xbf16>
    %cst_33 = arith.constant dense<0.000000e+00> : vector<8x4xf32>
    %62 = tpu.matmul %60, %61, %cst_33 {dimension_numbers = #tpu.dot_dimension_numbers<[1], [0], [0], [1], [0, 0, 1, 1], [], []>} : vector<8x32xbf16>, vector<32x4xbf16>, vector<8x4xf32> -> vector<8x4xf32>
    %63 = arith.addf %22, %62 : vector<8x4xf32>
    %cst_34 = arith.constant dense<0.000000e+00> : vector<32xf32>
    %64 = vector.multi_reduction <add>, %59, %cst_34 [0] : vector<8x32xf32> to vector<32xf32>
    %65 = vector.shape_cast %64 : vector<32xf32> to vector<1x32xf32>
    %cst_35 = arith.constant 8.000000e+00 : f32
    %66 = vector.broadcast %cst_35 : f32 to vector<1x32xf32>
    %67 = arith.divf %65, %66 : vector<1x32xf32>
    %c0_36 = arith.constant 0 : index
    %c0_37 = arith.constant 0 : index
    %68 = vector.load %arg11[%c0_36, %c0_37] : memref<1x32xf32, #tpu.memory_space<vmem>>, vector<1x32xf32>
    %69 = arith.mulf %67, %68 : vector<1x32xf32>
    %cst_38 = arith.constant dense<0.000000e+00> : vector<1xf32>
    %70 = vector.multi_reduction <add>, %69, %cst_38 [1] : vector<1x32xf32> to vector<1xf32>
    %71 = vector.shape_cast %70 : vector<1xf32> to vector<1x1xf32>
    %72 = arith.negf %71 : vector<1x1xf32>
    %73 = math.exp %72 : vector<1x1xf32>
    %cst_39 = arith.constant 1.000000e+00 : f32
    %74 = vector.broadcast %cst_39 : f32 to vector<1x1xf32>
    %75 = arith.addf %74, %73 : vector<1x1xf32>
    %76 = arith.divf %74, %75 : vector<1x1xf32>
    %77 = vector.shape_cast %76 : vector<1x1xf32> to vector<1x1xf32>
    %78 = vector.broadcast %77 : vector<1x1xf32> to vector<8x1xf32>
    %cst_40 = arith.constant 0.000000e+00 : f32
    %79 = vector.broadcast %cst_40 : f32 to vector<8x91xf32>
    %80 = tpu.concatenate %59, %63, %78, %79 in 1 : vector<8x32xf32>, vector<8x4xf32>, vector<8x1xf32>, vector<8x91xf32> -> vector<8x128xf32>
    %c0_41 = arith.constant 0 : index
    %c0_42 = arith.constant 0 : index
    %81 = vector.load %arg12[%c0_41, %c0_42] : memref<8x128xf32, #tpu.memory_space<vmem>>, vector<8x128xf32>
    tpu.vector_store %arg12[%c0_41, %c0_42], %80 {strides = array<i32>} : memref<8x128xf32, #tpu.memory_space<vmem>>, vector<8x128xf32>,
    return
  }
}

</mosaic_0001>

<bundles_post_ra>
// kernel: tpu_custom_call.1
= control target key start
LH: loop header
LB: loop body
LE: loop exit
PB: predicated region body
PF: predicated region fallthrough
CT: control target
= control target key end

     0   :  { %vm68_vm0 = vcmask 1041408   ;;  %vm96_vm1 = vcmask 31744   ;;  %s805_s0 = inlined_call_operand.vmem [shape: bf16[8,36], index: 0, kind: input, shape index: {}]   ;;  %s806_s1 = inlined_call_operand.vmem [shape: bf16[16,4], index: 1, kind: input, shape index: {}]   ;;  %s807_s2 = inlined_call_operand.vmem [shape: s32[16,1], index: 2, kind: input, shape index: {}]   ;;  %s808_s3 = inlined_call_operand.vmem [shape: s32[16,1], index: 3, kind: input, shape index: {}]   ;;  %s809_s4 = inlined_call_operand.vmem [shape: s32[1,16], index: 4, kind: input, shape index: {}]   ;;  %s810_s5 = inlined_call_operand.vmem [shape: bf16[36,32], index: 5, kind: input, shape index: {}]   ;;  %s811_s6 = inlined_call_operand.vmem [shape: bf16[4,32], index: 6, kind: input, shape index: {}]   ;;  %s812_s7 = inlined_call_operand.vmem [shape: bf16[32,32], index: 7, kind: input, shape index: {}]   ;;  %s813_s8 = inlined_call_operand.vmem [shape: bf16[32,512], index: 8, kind: input, shape index: {}]   ;;  %s814_s9 = inlined_call_operand.vmem [shape: bf16[32,32], index: 9, kind: input, shape index: {}]   ;;  %s815_s10 = inlined_call_operand.vmem [shape: bf16[32,4], index: 10, kind: input, shape index: {}]   ;;  %s816_s11 = inlined_call_operand.vmem [shape: f32[1,32], index: 11, kind: input, shape index: {}]   ;;  %s817_s12 = inlined_call_operand.hbm [shape: f32[8,128], index: 12, kind: output, shape index: {}]  }
   0x1   :  { %v48_v0 = vld [vmem:[%s810_s5 + $0x10] sm:$0x3]  ;;  %v90_v2 = vld [vmem:[%s811_s6] sm:$0x3]  ;;  %v564_v9 = vld [vmem:[%s813_s8 + $0x24] sm:$0xf] }
   0x2   :  { %v58_v1 = vunpack.c.l.b16 %v48_v0  ;;  %v559_v3 = vld [vmem:[%s806_s1] sm:$0xff]  ;;  %v101_v4 = vsel %vm68_vm0, %v90_v2, 0  ;;  %v566_v6 = vld [vmem:[%s813_s8 + $0x2c] sm:$0xf0]  ;;  %v508_v10 = vld [vmem:[%s813_s8 + $0x30] sm:$0xf0] }
   0x3   :  { %v506_v5 = vld [vmem:[%s813_s8 + $0x20] sm:$0xf]  ;;  %110 = vmatpush.bf16.msra.mxu1 %v101_v4  ;;  %v514_v11 = vld [vmem:[%s813_s8 + $0x28] sm:$0xf]  ;;  %v511_v12 = vor.u32 %v564_v9, %v508_v10  ;;  %v567_v13 = vld [vmem:[%s813_s8 + $0x34] sm:$0xf0] }
   0x4   :  { %v61_v7 = vpack.c.b16 %v58_v1, %v58_v1  ;;  %v507_v8 = vor.u32 %v566_v6, %v506_v5 }
   0x5   :  { %17 = vsyncpa [#allocation3], 0  ;;  %v515_v15 = vor.u32 %v567_v13, %v514_v11  ;;  %v558_v16 = vld [vmem:[%s810_s5 + $0x8] sm:$0xff]  ;;  %195 = vmatpush.bf16.msra.mxu3 %v511_v12  ;;  %v557_v17 = vld [vmem:[%s810_s5] sm:$0xff]  ;;  %vm64_vm2 = vcmask 293888   ;;  %v614_v28 = vmov 0   ;;  %v228_v55 = vlaneseq }
   0x6   :  { %v70_v14 = vsel %vm68_vm0, %v61_v7, 0  ;;  %182 = vmatpush.bf16.msra.mxu2 %v507_v8  ;;  %487 = vmatmul.msk.bf16.vlgmr.msra.gmra.mxu1 %vm96_vm1, %v559_v3  ;;  %v43_v18 = vld [vmem:[%s805_s0] sm:$0xf]  ;;  %v562_v20 = vld [vmem:[%s813_s8 + $0xc] sm:$0xf0]  ;;  %v241_v33 = vld [vmem:[%s808_s3 + $0x8] sm:$0xff] }
   0x7   :  { %77 = vmatpush.bf16.msra.mxu0 %v70_v14  ;;  %208 = vmatpush.bf16.msrb.mxu1 %v515_v15  ;;  %v490_v19 = vld [vmem:[%s813_s8] sm:$0xf]  ;;  %v560_v21 = vld [vmem:[%s813_s8 + $0x4] sm:$0xf]  ;;  %v492_v23 = vld [vmem:[%s813_s8 + $0x10] sm:$0xf0] }
   0x8   :  { %v491_v22 = vor.u32 %v562_v20, %v490_v19  ;;  %v498_v24 = vld [vmem:[%s813_s8 + $0x8] sm:$0xf]  ;;  %v563_v25 = vld [vmem:[%s813_s8 + $0x14] sm:$0xf0]  ;;  %v495_v26 = vor.u32 %v560_v21, %v492_v23  ;;  %580 = vset.pattern.permute.xlu1 %v614_v28  ;;  %579 = vset.pattern.permute.xlu0 %v614_v28  ;;  %v240_v29 = vld [vmem:[%s808_s3] sm:$0xff]  ;;  %v243_v38 = vadd.s32 8, %v241_v33 }
   0x9   :  { %v499_v27 = vor.u32 %v563_v25, %v498_v24  ;;  %v242_v30 = vadd.s32 8, %v240_v29  ;;  %v230_v31 = vld [vmem:[%s807_s2] sm:$0xff]  ;;  %v565_v32 = vld [vmem:[%s813_s8 + $0x2c] sm:$0xf]  ;;  %v516_v34 = vld [vmem:[%s813_s8 + $0x38] sm:$0xf0] }
   0xa   :  { %183 = vmatpush.bf16.msra.mxu2 %v491_v22  ;;  %196 = vmatpush.bf16.msra.mxu3 %v495_v26  ;;  %v519_v35 = vor.u32 %v565_v32, %v516_v34  ;;  %v561_v36 = vld [vmem:[%s813_s8 + $0xc] sm:$0xf]  ;;  %v500_v37 = vld [vmem:[%s813_s8 + $0x18] sm:$0xf0]  ;;  %v568_v42 = vld [vmem:[%s812_s7] sm:$0xff]  ;;  %vm172_vm4 = vcmask 261120  }
   0xb   :  { %78 = vmatpush.bf16.msra.mxu0 %v558_v16  ;;  %209 = vmatpush.bf16.msrb.mxu1 %v499_v27  ;;  %v231_v39 = vld [vmem:[%s807_s2 + $0x8] sm:$0xff]  ;;  %v503_v40 = vor.u32 %v561_v36, %v500_v37  ;;  %v581_v56 = vld [vmem:[%s809_s4] ss:$0 sm:$0xff]  ;;  %v260_v57 = vshrl.u32 %v228_v55, 7  ;;  %v615_v58 = vmov 0.0   ;;  %v229_v62 = vand.u32 127, %v228_v55 }
   0xc   :  { %245 = vperm.xlu1 %580, %v242_v30   ;;  %233 = vperm.xlu0 %579, %v230_v31   ;;  %v569_v41 = vld [vmem:[%s812_s7 + $0x8] sm:$0xff]  ;;  %vm302_vm14 = vcmask 130048   ;;  %v570_v24 = vld [vmem:[%s814_s9] sm:$0xff]  ;;  %v616_v30 = vmov 8.0   ;;  %vm425_vm0 = vcmask 253952   ;;  %s617_s18 = smov 32  }
   0xd   :  { %vm263_vm7 = vcmp.eq.s32.totalorder %v260_v57, %v581_v56  ;;  %v571_v13 = vld [vmem:[%s814_s9 + $0x8] sm:$0xff]  ;;  %v572_v29 = vld [vmem:[%s815_s10] sm:$0xff]  ;;  %582 = vrcp.f32 %v616_v30  ;;  %s465_s22 = sshll.u32 %s817_s12, 4  ;;  %s466_s22 = int_to_ptr.hbm [resolvable:$true] %s465_s22 }
   0xe   :  { %221 = vmatpush.bf16.msrb.mxu2 %v519_v35  ;;  %294 = vmatpush.bf16.msrb.mxu3 %v569_v41  ;;  %v526_v59 = vsel %vm263_vm7, 1.0, %v615_v58  ;;  %v573_v28 = vld [vmem:[%s815_s10 + $0x8] sm:$0xff]  ;;  %vm455_vm7 = vcmask 302080  }
   0xf   :  { %79 = vmatpush.bf16.msra.mxu0 %v557_v17  ;;  %v266_v23 = vpack.c.bf16 %v526_v59, %v526_v59 }
  0x12   :  { %482 = vmatmul.msk.bf16.vlgmr.msra.gmra.mxu0 %vm64_vm2, %v43_v18  ;;  %222 = vmatpush.bf16.msrb.mxu2 %v503_v40 }
  0x13   :  { %295 = vmatpush.bf16.msrb.mxu3 %v568_v42  ;;  %v583_v31 = vpop.eup %582 }
  0x14   :  { %248 = vperm.xlu1 %580, %v243_v38   ;;  %236 = vperm.xlu0 %579, %v231_v39   ;;  %v416_v32 = vmul.f32 8.0, %v583_v31  ;;  %vm420_vm15 = vweird.f32 %v583_v31 }
  0x16   :  { %v417_v36 = vsub.f32 1.0, %v416_v32 }
  0x18   :  { %v418_v40 = vmul.f32 %v583_v31, %v417_v36 }
  0x7e   :  { %v246_v60 = vpop.permute.xlu1 %245  ;;  %v234_v61 = vpop.permute.xlu0 %233 }
  0x7f   :  { %vm250_vm8 = vcmp.eq.s32.totalorder %v229_v62, %v246_v60  ;;  %vm238_vm9 = vcmp.eq.s32.totalorder %v229_v62, %v234_v61 }
  0x80   :  { %vm252_vm12 = vmor %vm238_vm9, %vm250_vm8 }
  0x81   :  { %v524_v4 = vsel %vm252_vm12, 1.0, %v615_v58 }
  0x83   :  { %v112_v43 = vpop.f32.mrf.mxu1 }
  0x84   :  { %v119_v50 = vmul.f32 0.01, %v112_v43  ;;  %vm117_vm5 = vcmp.gt.f32.partialorder %v112_v43, 0.0 }
  0x86   :  { %v121_v52 = vsel %vm117_vm5, %v112_v43, %v119_v50  ;;  %v249_v63 = vpop.permute.xlu1 %248  ;;  %v237_v0 = vpop.permute.xlu0 %236 }
  0x87   :  { %vm251_vm10 = vcmp.eq.s32.totalorder %v229_v62, %v249_v63  ;;  %vm239_vm11 = vcmp.eq.s32.totalorder %v229_v62, %v237_v0 }
  0x88   :  { %vm253_vm13 = vmor %vm239_vm11, %vm251_vm10 }
  0x89   :  { %v525_v5 = vsel %vm253_vm13, 1.0, %v615_v58 }
  0x8a   :  { %v258_v8 = vpack.c.bf16 %v525_v5, %v524_v4 }
  0x8b   :  { %v114_v49 = vpop.f32.mrf.mxu1 }
  0x8c   :  { %v120_v51 = vmul.f32 0.01, %v114_v49  ;;  %vm118_vm6 = vcmp.gt.f32.partialorder %v114_v49, 0.0 }
  0x8e   :  { %v122_v53 = vsel %vm118_vm6, %v114_v49, %v120_v51  ;;  %v423_v49 = vld [vmem:[%s816_s11] sm:$0x1]  ;;  %s618_s11 = smov [#allocation2]  }
  0x8f   :  { %v81_v44 = vpop.f32.mrf.mxu0  ;;  %v268_v54 = vpack.c.bf16 %v122_v53, %v121_v52  ;;  %s463_s19 = sshll.u32 %s618_s11, 4  ;;  %s464_s19 = int_to_ptr.vmem [resolvable:$true] %s463_s19 }
  0x90   :  { %vm85_vm3 = vcmp.gt.f32.partialorder %v81_v44, 0.0  ;;  %v86_v45 = vmul.f32 0.01, %v81_v44 }
  0x92   :  { %v87_v46 = vsel %vm85_vm3, %v81_v44, %v86_v45  ;;  %v419_v44 = vadd.f32 %v583_v31, %v418_v40 }
  0x93   :  { %v123_v47 = vpack.c.bf16 %v87_v46, %v87_v46 }
  0x95   :  { %520 = vmatmul.msk.bf16.vlgmr.msra.gmra.mxu2 %vm172_vm4, %v123_v47  ;;  %521 = vmatmul.msk.bf16.vlgmr.msra.gmra.mxu3 %vm172_vm4, %v123_v47 }
  0x96   :  { %522 = vmatmul.msk.bf16.vlgmr.msrb.gmra.mxu1 %vm172_vm4, %v123_v47  ;;  %365 = vmatpush.bf16.msra.mxu2 %v571_v13 }
  0x97   :  { %v83_v48 = vpop.f32.mrf.mxu0  ;;  %400 = vmatpush.bf16.msra.mxu3 %v573_v28 }
  0x9a   :  { %366 = vmatpush.bf16.msra.mxu2 %v570_v24 }
  0x9b   :  { %401 = vmatpush.bf16.msra.mxu3 %v572_v29 }
  0xa5   :  { %523 = vmatmul.msk.bf16.vlgmr.msrb.gmra.mxu2 %vm172_vm4, %v123_v47  ;;  %535 = vmatmul.msk.bf16.vlgmr.msrb.gmra.mxu3 %vm172_vm4, %v268_v54  ;;  %v421_v47 = vsel %vm420_vm15, %v583_v31, %v419_v44 }
 0x113   :  { %v211_v1 = vpop.f32.mrf.mxu1 }
 0x118   :  { %v185_v2 = vpop.f32.mrf.mxu2  ;;  %v198_v3 = vpop.f32.mrf.mxu3 }
 0x119   :  { %v267_v6 = vpack.c.bf16 %v198_v3, %v185_v2 }
 0x11b   :  { %v213_v7 = vpop.f32.mrf.mxu1  ;;  %313 = vmatpush.bf16.msrb.mxu0 %v267_v6 }
 0x11e   :  { %536 = vmatmul.msk.bf16.vlgmr.msrb.gmra.mxu0 %vm302_vm14, %v258_v8 }
 0x120   :  { %v187_v9 = vpop.f32.mrf.mxu2  ;;  %v200_v10 = vpop.f32.mrf.mxu3 }
 0x128   :  { %v224_v11 = vpop.f32.mrf.mxu2  ;;  %v297_v14 = vpop.f32.mrf.mxu3 }
 0x130   :  { %v226_v12 = vpop.f32.mrf.mxu2  ;;  %v299_v17 = vpop.f32.mrf.mxu3 }
 0x19b   :  { %v315_v15 = vpop.f32.mrf.mxu0 }
 0x19c   :  { %v316_v16 = vadd.f32 %v315_v15, %v297_v14 }
 0x19e   :  { %v320_v20 = vmax.f32 %v316_v16, 0.0 }
 0x1a3   :  { %v317_v18 = vpop.f32.mrf.mxu0 }
 0x1a4   :  { %v318_v19 = vadd.f32 %v317_v18, %v299_v17 }
 0x1a6   :  { %v321_v21 = vmax.f32 %v318_v19, 0.0 }
 0x1a8   :  { %v322_v22 = vpack.c.bf16 %v321_v21, %v320_v20 }
 0x1aa   :  { %333 = vmatpush.bf16.msra.mxu1 %v322_v22 }
 0x1ad   :  { %537 = vmatmul.msk.bf16.vlgmr.msra.gmra.mxu1 %vm302_vm14, %v266_v23 }
 0x22a   :  { %v335_v25 = vpop.f32.mrf.mxu1 }
 0x22b   :  { %v339_v26 = vpack.c.bf16 %v335_v25, %v335_v25 }
 0x22d   :  { %546 = vmatmul.msk.bf16.vlgmr.msra.gmra.mxu2 %vm172_vm4, %v339_v26 }
 0x232   :  { %v337_v27 = vpop.f32.mrf.mxu1 }
 0x2b0   :  { %v368_v33 = vpop.f32.mrf.mxu2 }
 0x2b1   :  { %v372_v34 = vadd.f32 %v368_v33, %v211_v1 }
 0x2b3   :  { %v373_v35 = vmax.f32 %v372_v34, 0.0 }
 0x2b5   :  { %v374_v37 = vpack.c.bf16 %v373_v35, %v373_v35  ;;  %v408_v38 = vsel %vm172_vm4, %v373_v35, 0.0 }
 0x2b6   :  { %v409_v39 = vrot.slane %v408_v38, 4 }
 0x2b7   :  { %555 = vmatmul.msk.bf16.vlgmr.msra.gmra.mxu3 %vm172_vm4, %v374_v37 }
 0x2b8   :  { %v410_v41 = vadd.f32 %v409_v39, %v408_v38  ;;  %v370_v42 = vpop.f32.mrf.mxu2 }
 0x2ba   :  { %v411_v43 = vrot.slane %v410_v41, 2 }
 0x2bc   :  { %v412_v45 = vadd.f32 %v411_v43, %v410_v41 }
 0x2be   :  { %v413_v46 = vrot.slane %v412_v45, 1 }
 0x2c0   :  { %v414_v48 = vadd.f32 %v413_v46, %v412_v45 }
 0x2c2   :  { %v422_v50 = vmul.f32 %v421_v47, %v414_v48 }
 0x2c4   :  { %v424_v51 = vmul.f32 %v423_v49, %v422_v50 }
 0x2c6   :  { %v426_v52 = vsel %vm425_vm0, %v424_v51, 0.0 }
 0x2c7   :  { %427 = vadd.xlane.f32.xlu2 %v426_v52 }
 0x33a   :  { %v403_v53 = vpop.f32.mrf.mxu3  ;;  %v428_v56 = vpop.xlane.xlu2 %427 }
 0x33b   :  { %v407_v54 = vadd.f32 %v403_v53, %v224_v11  ;;  %v556_v57 = vmul.f32 -1.442695, %v428_v56 }
 0x33d   :  { %450 = vrot.lane.b32.xlu2 %v407_v54, %s617_s18  ;;  %584 = vpow2.f32 %v556_v57 }
 0x342   :  { %v405_v55 = vpop.f32.mrf.mxu3 }
 0x343   :  { %v585_v58 = vpop.eup %584 }
 0x344   :  { %v432_v59 = vadd.f32 1.0, %v585_v58 }
 0x346   :  { %586 = vrcp.f32 %v432_v59  ;;  %v444_v1 = vand.u32 2147483648, %v432_v59  ;;  %vm438_vm3 = vweird.f32 %v432_v59  ;;  %v442_v2 = vand.u32 2147483647, %v432_v59 }
 0x348   :  { %v445_v4 = vor.u32 1.1754944e-38, %v444_v1  ;;  %vm443_vm6 = vcmp.eq.f32.partialorder %v442_v2, 8.507059e+37 }
 0x34c   :  { %v587_v60 = vpop.eup %586 }
 0x34d   :  { %v434_v61 = vmul.f32 %v587_v60, %v432_v59  ;;  %vm439_vm1 = vweird.f32 %v587_v60 }
 0x34e   :  { %vm440_vm5 = vmor %vm438_vm3, %vm439_vm1 }
 0x34f   :  { %v435_v62 = vsub.f32 1.0, %v434_v61 }
 0x351   :  { %v436_v63 = vmul.f32 %v587_v60, %v435_v62 }
 0x353   :  { %v437_v0 = vadd.f32 %v587_v60, %v436_v63 }
 0x355   :  { %v441_v3 = vsel %vm440_vm5, %v587_v60, %v437_v0 }
 0x356   :  { %v446_v5 = vsel %vm443_vm6, %v445_v4, %v441_v3 }
 0x357   :  { %v448_v6 = vperm.slane %v446_v5, 0 }
 0x397   :  { %v451_v7 = vpop.permute.xlu2 %450 }
 0x398   :  { %v453_v8 = vsel %vm172_vm4, %v373_v35, %v451_v7 }
 0x399   :  { %v454_v9 = vsel %vm64_vm2, %v453_v8, %v448_v6 }
 0x39a   :  { %v456_v10 = vsel %vm455_vm7, %v454_v9, 0.0 }
 0x39b   :  { %457 = vst [vmem:[#allocation2] sm:$0xff] %v456_v10 }
 0x39c   :  { %468 = dma.vmem_to_hbm [thread:$0]  %s464_s19, 128, %s466_s22, [#allocation3]  }
 0x39d   :  { %612 = dma.done.wait [#allocation3], 128  }
 0x39e   :  { %613 = vsyncadd [#allocation3], 4294967168 }
 0x39f   :  { %473 = vsyncpa [#allocation3], 1 }

</bundles_post_ra>
